<compile_context>
chip_gen: v7x
topology: tpu7x:2x2x1
jax: 0.10.0
libtpu: 0.0.40
codegen_flags: <defaults>
</compile_context>

<pallas_src>
import jax
import jax.numpy as jnp
from jax.experimental import pallas as pl
from jax.experimental.pallas import tpu as pltpu

LANE = 128
PACK = 8  # f32 sublane pack: x enters the kernel in f32, so 8-row granularity.


def _round_up(x, m):
    return ((x + m - 1) // m) * m


def mlp_kernel(x_ref, w1_ref, b1_ref, w2_ref, b2_ref, w3_ref, b3_ref, o_ref):
    cdt = w1_ref.dtype  # matmul-operand dtype (bf16 or f32)
    # x arrives as f32 straight from HBM; cast on the VPU (lots of slot slack here)
    # instead of paying a separate wrapper-side convert pass over HBM.
    x = x_ref[...].astype(cdt)
    # l1 + ReLU: MXU matmul with f32 accumulation, bias+ReLU in f32, then drop the
    # live activation to the compute dtype (halves activation VMEM at large tiles).
    h = jnp.dot(x, w1_ref[...], preferred_element_type=jnp.float32)
    h = jnp.maximum(h + b1_ref[...], 0.0).astype(cdt)
    # l2 + ReLU
    h = jnp.dot(h, w2_ref[...], preferred_element_type=jnp.float32)
    h = jnp.maximum(h + b2_ref[...], 0.0).astype(cdt)
    # l3 (no activation)
    out = jnp.dot(h, w3_ref[...], preferred_element_type=jnp.float32)
    o_ref[...] = (out + b3_ref[...]).astype(o_ref.dtype)


def prepare_params(params, *, use_bf16=True):
    """One-time weight prep: zero-pad the hidden dim to a full 128-lane vreg
    (exact: ReLU(0) == 0) and cast matmul operands to the compute dtype.
    Hoisted out of the per-call path because the weights are static."""
    in_size, hidden = params["w1"].shape
    out_size = params["w3"].shape[1]
    hp = _round_up(hidden, LANE)
    cdt = jnp.bfloat16 if use_bf16 else jnp.float32

    def pad2(a, rows, cols):
        return jnp.pad(a, ((0, rows - a.shape[0]), (0, cols - a.shape[1])))

    return {
        "_prepared": True,
        "_hidden": hidden,
        "w1": pad2(params["w1"], in_size, hp).astype(cdt),
        "b1": pad2(params["b1"], 1, hp).astype(jnp.float32),
        "w2": pad2(params["w2"], hp, hp).astype(cdt),
        "b2": pad2(params["b2"], 1, hp).astype(jnp.float32),
        "w3": pad2(params["w3"], hp, out_size).astype(cdt),
        "b3": params["b3"].astype(jnp.float32),
    }


def _vmem_capacity_bytes():
    try:
        info = pltpu.get_tpu_info()
        for attr in ("vmem_capacity_bytes", "vmem_bytes"):
            v = getattr(info, attr, None)
            if v:
                return int(v)
    except Exception:
        pass
    return 64 << 20  # conservative fallback: v7x per-TensorCore VMEM


def _choose_tile_b(B, tile_b, per_row_bytes, vmem_budget_bytes):
    # Largest tile the per-step VMEM working set allows (gen-aware cap).
    cap = max(PACK, (vmem_budget_bytes // max(per_row_bytes, 1)) // PACK * PACK)
    tb = min(_round_up(max(tile_b, 1), PACK), cap)
    if B >= PACK:
        # Never make the block taller than the array; any non-multiple-of-8 tail is
        # handled by the hang-over last block (masked writeback), not by padding.
        tb = min(tb, (B // PACK) * PACK)
    else:
        tb = PACK
    # Keep >=2 grid steps for non-tiny batches so ("parallel",) can actually shard
    # the grid across both v7x TensorCores.
    if B >= 512 and pl.cdiv(B, tb) < 2:
        tb = max(PACK, _round_up(pl.cdiv(B, 2), PACK))
    return tb


def neural_net_forward(x, params, *, tile_b=8192, use_bf16=True):
    """x: [B, input_size] float32. params: raw (init_params layout, i.e. weights as
    [in, out] = PyTorch nn.Linear weight transposed, biases (1, out)) or the output
    of prepare_params()."""
    p = params if params.get("_prepared", False) else prepare_params(params, use_bf16=use_bf16)
    w1, b1, w2, b2, w3, b3 = p["w1"], p["b1"], p["w2"], p["b2"], p["w3"], p["b3"]
    hidden = p["_hidden"]
    in_size, hp = w1.shape
    out_size = w3.shape[1]
    cdt_bytes = w1.dtype.itemsize

    B = x.shape[0]
    # Tiny-batch corner only (B < 8): a block must span at least one 8-row sublane.
    Bp = max(B, PACK)
    if Bp != B:
        x = jnp.pad(x, ((0, Bp - B), (0, 0)))

    # Gen-aware VMEM budget (~40% of physical: ~25 MiB on v7x, ~51 MiB on v5e/v6e),
    # used both to cap the batch tile and to set vmem_limit_bytes.
    vmem_cap = _vmem_capacity_bytes()
    per_row = (2 * in_size * 4                 # double-buffered f32 x tile
               + 2 * out_size * 4              # double-buffered f32 out tile
               + hp * (2 * 4 + 2 * cdt_bytes)) # f32 dot results + compute-dtype acts
    tb = _choose_tile_b(Bp, tile_b, per_row, int(0.4 * vmem_cap))
    grid = (pl.cdiv(Bp, tb),)

    wbytes = ((w1.size + w2.size + w3.size) * cdt_bytes
              + (b1.size + b2.size + b3.size) * 4)
    need = tb * per_row + wbytes
    vmem_limit = int(min(0.75 * vmem_cap, max(2 * need, 16 << 20)))

    # Real (unpadded-hidden) FLOPs; bytes match what actually crosses HBM.
    flops = 2 * B * (in_size * hidden + hidden * hidden + hidden * out_size)
    bytes_accessed = B * in_size * 4 + B * out_size * 4 + wbytes

    const = lambda shape: pl.BlockSpec(shape, lambda i: (0, 0))

    out = pl.pallas_call(
        mlp_kernel,
        out_shape=jax.ShapeDtypeStruct((Bp, out_size), jnp.float32),
        grid=grid,
        in_specs=[
            pl.BlockSpec((tb, in_size), lambda i: (i, 0)),   # batch-tiled f32 x
            const(w1.shape), const(b1.shape),                # VMEM-resident weights
            const(w2.shape), const(b2.shape),
            const(w3.shape), const(b3.shape),
        ],
        out_specs=pl.BlockSpec((tb, out_size), lambda i: (i, 0)),
        compiler_params=pltpu.CompilerParams(
            dimension_semantics=("parallel",),
            vmem_limit_bytes=vmem_limit,
        ),
        cost_estimate=pl.CostEstimate(
            flops=flops, transcendentals=0, bytes_accessed=bytes_accessed),
    )(x, w1, b1, w2, b2, w3, b3)

    return out if Bp == B else out[:B]


def init_params(key, input_size, hidden_size, output_size):
    """PyTorch Linear weight is [out, in]; store the transpose [in, out] so the
    kernel computes x @ W directly."""
    ks = jax.random.split(key, 6)

    def lin(kw, kb, fan_in, fan_out):
        bound = 1.0 / jnp.sqrt(jnp.float32(fan_in))
        w = jax.random.uniform(kw, (fan_in, fan_out), jnp.float32, -bound, bound)
        b = jax.random.uniform(kb, (1, fan_out), jnp.float32, -bound, bound)
        return w, b

    w1, b1 = lin(ks[0], ks[1], input_size, hidden_size)
    w2, b2 = lin(ks[2], ks[3], hidden_size, hidden_size)
    w3, b3 = lin(ks[4], ks[5], hidden_size, output_size)
    return {"w1": w1, "b1": b1, "w2": w2, "b2": b2, "w3": w3, "b3": b3}


def reference_forward(x, p):
    h1 = jnp.maximum(x @ p["w1"] + p["b1"], 0.0)
    h2 = jnp.maximum(h1 @ p["w2"] + p["b2"], 0.0)
    return h2 @ p["w3"] + p["b3"]


def reference_forward_matched(x, p, compute_dtype):
    """Replays the kernel's cast points (bf16 operands, f32 accumulation)."""
    f32 = jnp.float32
    c = lambda a: a.astype(compute_dtype).astype(f32)
    h1 = jnp.maximum(jnp.dot(c(x), c(p["w1"]), preferred_element_type=f32) + p["b1"], 0.0)
    h2 = jnp.maximum(jnp.dot(c(h1), c(p["w2"]), preferred_element_type=f32) + p["b2"], 0.0)
    return jnp.dot(c(h2), c(p["w3"]), preferred_element_type=f32) + p["b3"]


if __name__ == "__main__":
    # Small shapes consistent with the module: input_size = vocab size,
    # hidden_size = 8 (as in the script), output_size = number of tags.
    batch, input_size, hidden_size, output_size = 20, 32, 8, 6

    key = jax.random.PRNGKey(0)
    kx, kp = jax.random.split(key)
    x = jax.random.normal(kx, (batch, input_size), jnp.float32)
    params = init_params(kp, input_size, hidden_size, output_size)
    prepared = prepare_params(params)  # one-time weight pad/cast, reused below

    # Default path: tile clamps to 16 rows -> 2 grid steps, last block hangs over by
    # 12 masked rows (exercises the no-pad boundary handling).
    out = jax.block_until_ready(neural_net_forward(x, prepared))
    # Small-tile path: 3 grid steps with a partial last block.
    out_tiled = jax.block_until_ready(neural_net_forward(x, prepared, tile_b=8))
    # Exactly-covered path (no hang-over), single grid step, larger batch.
    x2 = jax.random.normal(jax.random.PRNGKey(1), (64, input_size), jnp.float32)
    out2 = jax.block_until_ready(neural_net_forward(x2, prepared))

    ref_bf16 = reference_forward_matched(x, params, jnp.bfloat16)
    ref_f32 = reference_forward(x, params)
    ref2_bf16 = reference_forward_matched(x2, params, jnp.bfloat16)

    assert out.shape == (batch, output_size)
    # Tiling / boundary handling must not change the per-row math.
    assert jnp.allclose(out, out_tiled, atol=1e-5, rtol=1e-5)
    # Tight check vs. a reference that mimics the kernel's bf16 cast points.
    assert jnp.allclose(out, ref_bf16, atol=5e-3, rtol=5e-3)
    assert jnp.allclose(out2, ref2_bf16, atol=5e-3, rtol=5e-3)
    # Semantic check vs. the pure-f32 PyTorch-equivalent forward (bf16 tolerance).
    assert jnp.allclose(out, ref_f32, atol=5e-2, rtol=5e-2)
    print("KERNEL_OK")
</pallas_src>

<mosaic_0001>
module attributes {stable_mosaic.version = 11 : i64} {
  func.func @mlp_kernel(%arg0: i32, %arg1: memref<16x32xf32, #tpu.memory_space<vmem>>, %arg2: memref<32x128xbf16, #tpu.memory_space<vmem>>, %arg3: memref<1x128xf32, #tpu.memory_space<vmem>>, %arg4: memref<128x128xbf16, #tpu.memory_space<vmem>>, %arg5: memref<1x128xf32, #tpu.memory_space<vmem>>, %arg6: memref<128x6xbf16, #tpu.memory_space<vmem>>, %arg7: memref<1x6xf32, #tpu.memory_space<vmem>>, %arg8: memref<16x6xf32, #tpu.memory_space<vmem>>) attributes {dimension_semantics = [#tpu.dimension_semantics<parallel>], iteration_bounds = array<i64: 2>, scalar_prefetch = 0 : i64, scratch_operands = 0 : i64, tpu.core_type = #tpu.core_type<tc>, window_params = [{transform_indices = @transform_0, window_bounds = array<i64: 16, 32>}, {pipeline_mode = #tpu.pipeline_mode<synchronous>, transform_indices = @transform_1, window_bounds = array<i64: 32, 128>}, {pipeline_mode = #tpu.pipeline_mode<synchronous>, transform_indices = @transform_2, window_bounds = array<i64: 1, 128>}, {pipeline_mode = #tpu.pipeline_mode<synchronous>, transform_indices = @transform_3, window_bounds = array<i64: 128, 128>}, {pipeline_mode = #tpu.pipeline_mode<synchronous>, transform_indices = @transform_4, window_bounds = array<i64: 1, 128>}, {pipeline_mode = #tpu.pipeline_mode<synchronous>, transform_indices = @transform_5, window_bounds = array<i64: 128, 6>}, {pipeline_mode = #tpu.pipeline_mode<synchronous>, transform_indices = @transform_6, window_bounds = array<i64: 1, 6>}, {transform_indices = @transform_7, window_bounds = array<i64: 16, 6>}]} {
    %c0 = arith.constant 0 : index
    %c0_0 = arith.constant 0 : index
    %0 = vector.load %arg1[%c0, %c0_0] : memref<16x32xf32, #tpu.memory_space<vmem>>, vector<16x32xf32>
    %1 = arith.truncf %0 : vector<16x32xf32> to vector<16x32xbf16>
    %c0_1 = arith.constant 0 : index
    %c0_2 = arith.constant 0 : index
    %2 = vector.load %arg2[%c0_1, %c0_2] : memref<32x128xbf16, #tpu.memory_space<vmem>>, vector<32x128xbf16>
    %cst = arith.constant dense<0.000000e+00> : vector<16x128xf32>
    %3 = tpu.matmul %1, %2, %cst {dimension_numbers = #tpu.dot_dimension_numbers<[1], [0], [0], [1], [0, 0, 1, 1], [], []>} : vector<16x32xbf16>, vector<32x128xbf16>, vector<16x128xf32> -> vector<16x128xf32>
    %c0_3 = arith.constant 0 : index
    %c0_4 = arith.constant 0 : index
    %4 = vector.load %arg3[%c0_3, %c0_4] : memref<1x128xf32, #tpu.memory_space<vmem>>, vector<1x128xf32>
    %5 = vector.broadcast %4 : vector<1x128xf32> to vector<16x128xf32>
    %6 = arith.addf %3, %5 : vector<16x128xf32>
    %cst_5 = arith.constant 0.000000e+00 : f32
    %7 = vector.broadcast %cst_5 : f32 to vector<16x128xf32>
    %8 = arith.maximumf %6, %7 : vector<16x128xf32>
    %9 = arith.truncf %8 : vector<16x128xf32> to vector<16x128xbf16>
    %c0_6 = arith.constant 0 : index
    %c0_7 = arith.constant 0 : index
    %10 = vector.load %arg4[%c0_6, %c0_7] : memref<128x128xbf16, #tpu.memory_space<vmem>>, vector<128x128xbf16>
    %cst_8 = arith.constant dense<0.000000e+00> : vector<16x128xf32>
    %11 = tpu.matmul %9, %10, %cst_8 {dimension_numbers = #tpu.dot_dimension_numbers<[1], [0], [0], [1], [0, 0, 1, 1], [], []>} : vector<16x128xbf16>, vector<128x128xbf16>, vector<16x128xf32> -> vector<16x128xf32>
    %c0_9 = arith.constant 0 : index
    %c0_10 = arith.constant 0 : index
    %12 = vector.load %arg5[%c0_9, %c0_10] : memref<1x128xf32, #tpu.memory_space<vmem>>, vector<1x128xf32>
    %13 = vector.broadcast %12 : vector<1x128xf32> to vector<16x128xf32>
    %14 = arith.addf %11, %13 : vector<16x128xf32>
    %cst_11 = arith.constant 0.000000e+00 : f32
    %15 = vector.broadcast %cst_11 : f32 to vector<16x128xf32>
    %16 = arith.maximumf %14, %15 : vector<16x128xf32>
    %17 = arith.truncf %16 : vector<16x128xf32> to vector<16x128xbf16>
    %c0_12 = arith.constant 0 : index
    %c0_13 = arith.constant 0 : index
    %18 = vector.load %arg6[%c0_12, %c0_13] : memref<128x6xbf16, #tpu.memory_space<vmem>>, vector<128x6xbf16>
    %cst_14 = arith.constant dense<0.000000e+00> : vector<16x6xf32>
    %19 = tpu.matmul %17, %18, %cst_14 {dimension_numbers = #tpu.dot_dimension_numbers<[1], [0], [0], [1], [0, 0, 1, 1], [], []>} : vector<16x128xbf16>, vector<128x6xbf16>, vector<16x6xf32> -> vector<16x6xf32>
    %c0_15 = arith.constant 0 : index
    %c0_16 = arith.constant 0 : index
    %20 = vector.load %arg7[%c0_15, %c0_16] : memref<1x6xf32, #tpu.memory_space<vmem>>, vector<1x6xf32>
    %21 = vector.broadcast %20 : vector<1x6xf32> to vector<16x6xf32>
    %22 = arith.addf %19, %21 : vector<16x6xf32>
    %c0_17 = arith.constant 0 : index
    %c0_18 = arith.constant 0 : index
    %23 = vector.load %arg8[%c0_17, %c0_18] : memref<16x6xf32, #tpu.memory_space<vmem>>, vector<16x6xf32>
    tpu.vector_store %arg8[%c0_17, %c0_18], %22 {strides = array<i32>} : memref<16x6xf32, #tpu.memory_space<vmem>>, vector<16x6xf32>,
    return
  }
  func.func @transform_0(%arg0: i32) -> (i32, i32) {
    %c0_i32 = arith.constant 0 : i32
    %c0_i32_0 = arith.constant 0 : i32
    return %arg0, %c0_i32 : i32, i32
  }
  func.func @transform_1(%arg0: i32) -> (i32, i32) {
    %c0_i32 = arith.constant 0 : i32
    %c0_i32_0 = arith.constant 0 : i32
    %c0_i32_1 = arith.constant 0 : i32
    return %c0_i32, %c0_i32_0 : i32, i32
  }
  func.func @transform_2(%arg0: i32) -> (i32, i32) {
    %c0_i32 = arith.constant 0 : i32
    %c0_i32_0 = arith.constant 0 : i32
    %c0_i32_1 = arith.constant 0 : i32
    return %c0_i32, %c0_i32_0 : i32, i32
  }
  func.func @transform_3(%arg0: i32) -> (i32, i32) {
    %c0_i32 = arith.constant 0 : i32
    %c0_i32_0 = arith.constant 0 : i32
    %c0_i32_1 = arith.constant 0 : i32
    return %c0_i32, %c0_i32_0 : i32, i32
  }
  func.func @transform_4(%arg0: i32) -> (i32, i32) {
    %c0_i32 = arith.constant 0 : i32
    %c0_i32_0 = arith.constant 0 : i32
    %c0_i32_1 = arith.constant 0 : i32
    return %c0_i32, %c0_i32_0 : i32, i32
  }
  func.func @transform_5(%arg0: i32) -> (i32, i32) {
    %c0_i32 = arith.constant 0 : i32
    %c0_i32_0 = arith.constant 0 : i32
    %c0_i32_1 = arith.constant 0 : i32
    return %c0_i32, %c0_i32_0 : i32, i32
  }
  func.func @transform_6(%arg0: i32) -> (i32, i32) {
    %c0_i32 = arith.constant 0 : i32
    %c0_i32_0 = arith.constant 0 : i32
    %c0_i32_1 = arith.constant 0 : i32
    return %c0_i32, %c0_i32_0 : i32, i32
  }
  func.func @transform_7(%arg0: i32) -> (i32, i32) {
    %c0_i32 = arith.constant 0 : i32
    %c0_i32_0 = arith.constant 0 : i32
    return %arg0, %c0_i32 : i32, i32
  }
}

</mosaic_0001>

<bundles_post_ra>
// kernel: tpu_custom_call.1
= control target key start
LH: loop header
LB: loop body
LE: loop exit
PB: predicated region body
PF: predicated region fallthrough
CT: control target
= control target key end

     0   :  { %12 = vsyncpa [#allocation3], 0  ;;  %s1605_s0 = inlined_call_operand.hbm [shape: f32[20,32], index: 0, kind: input, shape index: {}]   ;;  %s1606_s1 = inlined_call_operand.hbm [shape: bf16[32,128], index: 1, kind: input, shape index: {}]   ;;  %s1607_s2 = inlined_call_operand.vmem [shape: f32[1,128], index: 2, kind: input, shape index: {}]   ;;  %s1608_s3 = inlined_call_operand.vmem [shape: bf16[128,128], index: 3, kind: input, shape index: {}]   ;;  %s1609_s4 = inlined_call_operand.vmem [shape: f32[1,128], index: 4, kind: input, shape index: {}]   ;;  %s1610_s5 = inlined_call_operand.vmem [shape: bf16[128,6], index: 5, kind: input, shape index: {}]   ;;  %s1611_s6 = inlined_call_operand.vmem [shape: f32[1,6], index: 6, kind: input, shape index: {}]   ;;  %s1612_s7 = inlined_call_operand.vmem [shape: f32[20,6], index: 7, kind: output, shape index: {}]  }
   0x1   :  { %14 = vsyncpa [#allocation3 + $0x1], 0 }
   0x2   :  { %15 = vsyncpa [#allocation5], 0  ;;  %s1336_s24 = smov 0   ;;  %s1338_s25 = smov 0  }
   0x3   :  { %s1340_s26 = smov 0   ;;  %s1342_s27 = smov 0  }
   0x4 LB: > { %s1355_s28 = sadd.s32 4294967295, %s1254_s27   ;;  %s1358_s29 = sadd.s32 1, %s1254_s27   ;;  %s1254_s27 = sphi %s1342_s27, %s1630_s27   ;;  %s1250_s26 = sphi %s1340_s26, %s1629_s26   ;;  %s1246_s25 = sphi %s1338_s25, %s1628_s25   ;;  %s1242_s24 = sphi %s1336_s24, %s1627_s24  }
   0x5   : > { %s25_s30 = ssub.s32 %s1254_s27, %s1358_s29  ;;  %s28_s8 = sadd.s32 1, %s1250_s26 }
   0x6   : > { %p26_p0 = scmp.eq.s32.totalorder %s25_s30, 0  ;;  %p35_p1 = scmp.ne.s32.totalorder %s1250_s26, %s1246_s25 }
   0x7   : > { %p36_p2 = scmp.eq.s32.totalorder %s1254_s27, 0  ;;  %p41_p3 = scmp.ne.s32.totalorder %s1246_s25, %s1242_s24 }
   0x8   : > { %s1368_s9 = scalar_select %p26_p0, %s1250_s26, %s28_s8  }
   0x9   : > { %p1370_p4 = por %p36_p2, %p35_p1  ;;  %p1613_p5 = scmp.eq.s32.totalorder %s1355_s28, 0 }
   0xa   : > { %p191_p6 = scmp.eq.s32.totalorder %s1355_s28, 1  ;;  %p870_p7 = scmp.ge.s32.totalorder %s1254_s27, 1 }
   0xb   : > { %s1616_s10 = scalar_select %p1370_p4, 1, 0 }
   0xc   : > { %p1379_p8 = por %p1613_p5, %p41_p3  ;;  %p204_p9 = scmp.lt.s32.totalorder %s1254_s27, 3 }
   0xd   : > { %p1384_p10 = por %p191_p6, %p35_p1  ;;  %s1288_s14 = smov [#allocation4]  }
   0xe   : > { %s1617_s11 = scalar_select %p1379_p8, 1, 0 }
   0xf   : > { %s1618_s12 = scalar_select %p1384_p10, 1, 0 }
  0x10   : > { %p1388_p11 = pnand %p870_p7, %p204_p9  ;;  %s216_s15 = sshll.u32 %s1288_s14, 4  ;;  %s217_s15 = int_to_ptr.vmem [resolvable:$true] %s216_s15 }
  0x11   : > { %s1128_s19 = scalar_lea.hbm %s1606_s1, 256 }
  0x12   : > { %s1619_s13 = scalar_select %p1388_p11, 1, 0 }
  0x13   : > { %p1001_p12 = pneg %p1388_p11  ;;  %p1129_p0 = scmp.ne.s32.totalorder %s1606_s1, %s1128_s19 }
  0x14   : > { %p1135_p6 = scmp.lt.u32.totalorder %s1128_s19, %s1606_s1 }
  0x15   : > { %p1396_p13 = pnand %p1001_p12, %p1613_p5 }
  0x17   : > { %p1130_p1 = pneg %p1396_p13 }
  0x19   : > { %p1131_p2 = pnand %p1130_p1, %p1129_p0 }
  0x1b   : > { %p1132_p3 = pneg %p1131_p2 }
  0x1d   : > { %p1137_p7 = pnand %p1135_p6, %p1132_p3 }
  0x1f   : > { %1140 = shalt.err (!%p1137_p7)
}
  0x20   : > { %s1141_s24 = scalar_lea.vmem %s217_s15, 256  ;;  %p1149_p10 = scmp.lt.s32.totalorder %s217_s15, %s217_s15 }
  0x21   : > { %p1142_p9 = scmp.ne.s32.totalorder %s217_s15, %s1141_s24  ;;  %p1150_p8 = scmp.lt.s32.totalorder %s1141_s24, %s1141_s24 }
  0x23   : > { %p1144_p12 = pnand %p1142_p9, %p1130_p1  ;;  %p1151_p11 = por %p1150_p8, %p1149_p10 }
  0x25   : > { %p1145_p5 = pneg %p1144_p12 }
  0x27   : > { %p1152_p4 = pnand %p1151_p11, %p1145_p5 }
  0x29   : > { %1155 = shalt.err (!%p1152_p4)
}
  0x2a   : > { %s1289_s30 = smov 64   ;;  %s1290_s8 = smov 4  }
  0x2b   : > { %1004 = dma.hbm_to_vmem [thread:$0]  (!%p1396_p13), %s1606_s1, 256, %s217_s15, [#allocation5], %s1289_s30, %s1289_s30, %s1290_s8  }
  0x2c   : > { %p872_p0 = scmp.ge.s32.totalorder %s1254_s27, 2 }
  0x2d   : > { %p1621_p2 = scmp.ne.s32.totalorder (!%p872_p0), %s1616_s10, 0 }
  0x2e   : > { %241 = sbr.rel (%p872_p0) target bundleno = 88 (0x58), region = 40 }
  0x35   : > { %244 = sbr.rel (!%p1621_p2) target bundleno = 88 (0x58), region = 44  ;;  %s245_s18 = sand.u32 (%p1621_p2), 1, %s1250_s26  }
  0x36   : > { %s874_s19 = sshll.u32 (%p1621_p2), %s1254_s27, 1  ;;  %s873_s20 = sshll.u32 (%p1621_p2), %s245_s18, 4 }
  0x37   : > { %s251_s21 = ssub.s32 (%p1621_p2), 3, %s874_s19  ;;  %s1424_s23 = scalar_lea.sflag (%p1621_p2), [#allocation3], %s245_s18 }
  0x38   : > { %p252_p4 = scmp.lt.s32.totalorder (%p1621_p2), %s251_s21, 2  ;;  %s249_s15 = scalar_lea.vmem (%p1621_p2), [#allocation2], %s873_s20 }
  0x3c   : > { %s1632_s21 = smov (!%p252_p4, %s251_s21), 2 }
  0x3d   : > { %s1421_s22 = sshll.u32 %s1632_s21, 7 }
  0x3e   : > { %s256_s16 = ssub.s32 256, %s1421_s22 }
  0x3f   : > { %257 = vsyncadd %s1424_s23, %s256_s16  ;;  %p876_p5 = scmp.ne.s32.totalorder %s1421_s22, 0  ;;  %s923_s10 = sshll.u32 %s1254_s27, 8 }
  0x40   : > { %s1432_s8 = scalar_lea.hbm %s1605_s0, %s923_s10  ;;  %s262_s14 = sshll.u32 %s249_s15, 4  ;;  %s1434_s14 = int_to_ptr.vmem [resolvable:$true] %s262_s14 }
  0x41   : > { %s1156_s17 = scalar_lea.hbm %s1432_s8, %s1421_s22  ;;  %s1160_s27 = scalar_lea.hbm %s1605_s0, 384 }
  0x42   : > { %p1157_p8 = scmp.ne.s32.totalorder %s1432_s8, %s1156_s17  ;;  %p1161_p13 = scmp.lt.u32.totalorder %s1432_s8, %s1605_s0 }
  0x43   : > { %p1162_p1 = scmp.lt.u32.totalorder %s1160_s27, %s1156_s17  ;;  %p1164_p6 = scmp.lt.u32.totalorder %s1156_s17, %s1432_s8 }
  0x44   : > { %p1158_p10 = pnand %p1157_p8, %p876_p5 }
  0x45   : > { %p1163_p3 = por %p1162_p1, %p1161_p13 }
  0x46   : > { %p1159_p11 = pneg %p1158_p10 }
  0x47   : > { %p1165_p7 = por %p1164_p6, %p1163_p3 }
  0x49   : > { %p1166_p9 = pnand %p1165_p7, %p1159_p11 }
  0x4b   : > { %1169 = shalt.err (!%p1166_p9)
}
  0x4c   : > { %s1170_s16 = scalar_lea.vmem %s1434_s14, %s1421_s22  ;;  %s1291_s15 = smov [#allocation2]  }
  0x4d   : > { %p1171_p12 = scmp.ne.s32.totalorder %s1434_s14, %s1170_s16  ;;  %s1174_s10 = sshll.u32 %s1291_s15, 4  ;;  %s1175_s10 = int_to_ptr.vmem [resolvable:$false] %s1174_s10 }
  0x4e   : > { %s1176_s24 = scalar_lea.vmem %s1175_s10, 512  ;;  %p1177_p4 = scmp.lt.s32.totalorder %s1434_s14, %s1175_s10 }
  0x4f   : > { %p1172_p0 = pnand %p1171_p12, %p876_p5  ;;  %p1178_p8 = scmp.lt.s32.totalorder %s1176_s24, %s1170_s16 }
  0x51   : > { %p1173_p2 = pneg %p1172_p0  ;;  %p1179_p10 = por %p1178_p8, %p1177_p4 }
  0x53   : > { %p1180_p13 = pnand %p1179_p10, %p1173_p2 }
  0x55   : > { %1183 = shalt.err (!%p1180_p13)
}
  0x56   : > { %s1292_s30 = smov 128   ;;  %s1293_s17 = smov 8  }
  0x57   : > { %268 = dma.hbm_to_vmem [thread:$0]  (%p876_p5), %s1432_s8, %s1421_s22, %s1434_s14, %s1424_s23, %s1292_s30, %s1292_s30, %s1293_s17  }
  0x58 PF: > { %p1622_p11 = scmp.ne.s32.totalorder %s1619_s13, 0 }
  0x59   : > { %s276_s18 = sand.u32 (!%p1622_p11), 1, %s1246_s25   ;;  %p1623_p1 = scmp.ne.s32.totalorder (!%p1622_p11), %s1617_s11, 0 }
  0x5a   : > { %274 = sbr.rel (%p1622_p11) target bundleno = 817 (0x331), region = 48  ;;  %s1464_s19 = sshll.u32 (!%p1622_p11), %s276_s18, 4 }
  0x5b   : > { %s277_s27 = scalar_lea.sflag (!%p1622_p11), [#allocation3], %s276_s18  ;;  %s280_s20 = scalar_lea.vmem (!%p1622_p11), [#allocation2], %s1464_s19 }
  0x61   : > { %1233 = dma.done.wait (%p1623_p1), %s277_s27, 256  }
  0x62   : > { %1235 = vsyncadd (%p1623_p1), %s277_s27, 4294967040  ;;  %p1624_p5 = scmp.eq.s32.totalorder %s1355_s28, 0 }
  0x64   : > { %1237 = dma.done.wait (%p1624_p5), [#allocation5], 256   ;;  %p1625_p3 = pmov %p1624_p5 }
  0x65   : > { %v1294_v0 = vmov 0.0   ;;  %vm1295_vm0 = vmmov 0   ;;  %v1110_v1 = vld [vmem:[#allocation4] sm:$0xff]   ;;  %v1111_v2 = vld [vmem:[#allocation4 + $0x8] sm:$0xff]   ;;  %vm351_vm1 = vcmask 261120   ;;  %v1114_v8 = vld [vmem:[%s1608_s3 + $0x10] sm:$0xff]  }
  0x66   : > { %1239 = vsyncadd (%p1625_p3), [#allocation5], 4294967040  ;;  %948 = vmatprep.subr.bf16.mxu0 %v1294_v0  ;;  %952 = vmatprep.mubr.msk.bf16.mxu0 %vm1295_vm0, %v1294_v0  ;;  %v325_v3 = vld [vmem:[%s280_s20] sm:$0xff]  ;;  %v326_v4 = vld [vmem:[%s280_s20 + $0x8] sm:$0xff]  ;;  %vm626_vm2 = vcmask 48128   ;;  %s1557_s21 = scalar_lea.vmem [#allocation6], %s1464_s19  }
  0x67   : > { %956 = vmatprep.subr.bf16.mxu1 %v1294_v0  ;;  %972 = vmatprep.mubr.msk.bf16.mxu1 %vm1295_vm0, %v1294_v0  ;;  %v1112_v5 = vld [vmem:[%s1608_s3] sm:$0xff]   ;;  %v327_v6 = vpack.c.bf16 %v326_v4, %v325_v3  ;;  %v1113_v7 = vld [vmem:[%s1608_s3 + $0x8] sm:$0xff]   ;;  %v1115_v9 = vld [vmem:[%s1608_s3 + $0x18] sm:$0xff]   ;;  %p1626_p6 = scmp.ne.s32.totalorder %s1618_s12, 0 }
  0x68   : > { %949 = vmatpush3.bf16.msra.mxu0 %v1110_v1  ;;  %957 = vmatpush3.bf16.msra.mxu1 %v1112_v5  ;;  %v1116_v10 = vld [vmem:[%s1608_s3 + $0x20] sm:$0xff]   ;;  %v1117_v11 = vld [vmem:[%s1608_s3 + $0x28] sm:$0xff]   ;;  %v1118_v12 = vld [vmem:[%s1608_s3 + $0x30] sm:$0xff]   ;;  %s907_s16 = sshll.u32 (%p1626_p6), %s1355_s28, 1  ;;  %s924_s15 = sshll.u32 (%p1626_p6), %s1355_s28, 4 }
  0x69   : > { %950 = vmatprep.subr.bf16.mxu0 %v1294_v0  ;;  %958 = vmatprep.subr.bf16.mxu1 %v1294_v0  ;;  %v1119_v13 = vld [vmem:[%s1608_s3 + $0x38] sm:$0xff]   ;;  %v1120_v14 = vld [vmem:[%s1610_s5] sm:$0xff]   ;;  %v1121_v15 = vld [vmem:[%s1610_s5 + $0x8] sm:$0xff]   ;;  %s637_s10 = ssub.s32 (%p1626_p6), 3, %s907_s16  ;;  %s1568_s17 = scalar_lea.vmem (%p1626_p6), %s1612_s7, %s924_s15  }
  0x6a   : > { %v1122_v16 = vld [vmem:[%s1610_s5 + $0x10] sm:$0xff]   ;;  %v1123_v17 = vld [vmem:[%s1610_s5 + $0x18] sm:$0xff]   ;;  %v1124_v18 = vld [vmem:[%s1610_s5 + $0x20] sm:$0xff]   ;;  %p638_p7 = scmp.lt.s32.totalorder (%p1626_p6), %s637_s10, 2 }
  0x6b   : > { %v1125_v19 = vld [vmem:[%s1610_s5 + $0x28] sm:$0xff]   ;;  %v884_v20 = vld [vmem:[%s1607_s2] ss:$0 sm:$0xff]  ;;  %v1126_v30 = vld [vmem:[%s1610_s5 + $0x30] sm:$0xff]  }
  0x6c   : > { %951 = vmatpush3.bf16.msra.mxu0 %v1111_v2  ;;  %959 = vmatpush3.bf16.msra.mxu1 %v1113_v7  ;;  %v1127_v31 = vld [vmem:[%s1610_s5 + $0x38] sm:$0xff]   ;;  %v888_v32 = vld [vmem:[%s1609_s4] ss:$0 sm:$0xff] }
  0x6d   : > { %976 = vmatprep.subr.bf16.mxu0 %v1294_v0  ;;  %960 = vmatprep.subr.bf16.mxu1 %v1294_v0  ;;  %v897_v42 = vld [vmem:[%s1611_s6] ss:$0 sm:$0xff] }
  0x6f   : > { %953 = vmatmul.mubr.msk.bf16.vlgmr.msra.gmra.mrb[0].mxu0 %vm351_vm1, %v327_v6 }
  0x70   : > { %992 = vmatprep.mubr.msk.bf16.mxu0 %vm1295_vm0, %v1294_v0  ;;  %961 = vmatpush3.bf16.msra.mxu1 %v1114_v8 }
  0x71   : > { %962 = vmatprep.subr.bf16.mxu1 %v1294_v0  ;;  %977 = vmatpush3.bf16.msra.mxu0 %v1120_v14 }
  0x72   : > { %978 = vmatprep.subr.bf16.mxu0 %v1294_v0 }
  0x74   : > { %963 = vmatpush3.bf16.msra.mxu1 %v1115_v9 }
  0x75   : > { %964 = vmatprep.subr.bf16.mxu1 %v1294_v0  ;;  %979 = vmatpush3.bf16.msra.mxu0 %v1121_v15 }
  0x76   : > { %980 = vmatprep.subr.bf16.mxu0 %v1294_v0 }
  0x78   : > { %965 = vmatpush3.bf16.msra.mxu1 %v1116_v10 }
  0x79   : > { %966 = vmatprep.subr.bf16.mxu1 %v1294_v0  ;;  %981 = vmatpush3.bf16.msra.mxu0 %v1122_v16 }
  0x7a   : > { %982 = vmatprep.subr.bf16.mxu0 %v1294_v0 }
  0x7c   : > { %967 = vmatpush3.bf16.msra.mxu1 %v1117_v11 }
  0x7d   : > { %968 = vmatprep.subr.bf16.mxu1 %v1294_v0  ;;  %983 = vmatpush3.bf16.msra.mxu0 %v1123_v17 }
  0x7e   : > { %984 = vmatprep.subr.bf16.mxu0 %v1294_v0 }
  0x80   : > { %969 = vmatpush3.bf16.msra.mxu1 %v1118_v12 }
  0x81   : > { %970 = vmatprep.subr.bf16.mxu1 %v1294_v0  ;;  %985 = vmatpush3.bf16.msra.mxu0 %v1124_v18 }
  0x82   : > { %986 = vmatprep.subr.bf16.mxu0 %v1294_v0 }
  0x84   : > { %971 = vmatpush3.bf16.msra.mxu1 %v1119_v13 }
  0x85   : > { %987 = vmatpush3.bf16.msra.mxu0 %v1125_v19 }
  0x86   : > { %988 = vmatprep.subr.bf16.mxu0 %v1294_v0 }
  0x89   : > { %989 = vmatpush3.bf16.msra.mxu0 %v1126_v30 }
  0x8a   : > { %990 = vmatprep.subr.bf16.mxu0 %v1294_v0 }
  0x8d   : > { %991 = vmatpush3.bf16.msra.mxu0 %v1127_v31 }
 0x142   : > { %v389_v21 = vpop.f32.mrb[0].mxu0 }
 0x143   : > { %v390_v22 = vadd.f32 %v884_v20, %v389_v21  ;;  %v954_v23 = vpop.f32.mrb[1].mxu0 }
 0x144   : > { %v392_v24 = vpop.f32.mrb[2].mxu0 }
 0x145   : > { %v393_v25 = vadd.f32 %v884_v20, %v392_v24  ;;  %v955_v26 = vpop.f32.mrb[3].mxu0  ;;  %v396_v27 = vmax.f32 %v390_v22, 0.0 }
 0x147   : > { %v397_v28 = vmax.f32 %v393_v25, 0.0 }
 0x149   : > { %v398_v29 = vpack.c.bf16 %v397_v28, %v396_v27 }
 0x14b   : > { %973 = vmatmul.mubr.bf16.vlgmr.msra.gmra.mrb[0].mxu1 %v398_v29 }
 0x21e   : > { %v504_v33 = vpop.f32.mrb[0].mxu1 }
 0x21f   : > { %v505_v34 = vadd.f32 %v888_v32, %v504_v33  ;;  %v974_v35 = vpop.f32.mrb[1].mxu1 }
 0x220   : > { %v507_v36 = vpop.f32.mrb[2].mxu1 }
 0x221   : > { %v508_v37 = vadd.f32 %v888_v32, %v507_v36  ;;  %v975_v38 = vpop.f32.mrb[3].mxu1  ;;  %v511_v39 = vmax.f32 %v505_v34, 0.0 }
 0x223   : > { %v512_v40 = vmax.f32 %v508_v37, 0.0 }
 0x225   : > { %v513_v41 = vpack.c.bf16 %v512_v40, %v511_v39 }
 0x227   : > { %993 = vmatmul.mubr.bf16.vlgmr.msra.gmra.mrb[4].mxu0 %v513_v41 }
 0x2f9   : > { %635 = sbr.rel (!%p1626_p6) target bundleno = 817 (0x331), region = 60 }
 0x2fa   : > { %v619_v43 = vpop.f32.mrb[4].mxu0 }
 0x2fb   : > { %v620_v44 = vadd.f32 %v897_v42, %v619_v43  ;;  %v994_v45 = vpop.f32.mrb[5].mxu0 }
 0x2fc   : > { %v622_v46 = vpop.f32.mrb[6].mxu0 }
 0x2fd   : > { %627 = vst.msk [vmem:[%s1557_s21] sm:$0xff] %vm626_vm2, %v620_v44  ;;  %v623_v47 = vadd.f32 %v897_v42, %v622_v46  ;;  %v995_v48 = vpop.f32.mrb[7].mxu0 }
 0x2ff   : > { %628 = vst.msk [vmem:[%s1557_s21 + $0x8] sm:$0xff] %vm626_vm2, %v623_v47 }
 0x300   : > { %s1634_s10 = smov (!%p638_p7, %s637_s10), 2 }
 0x301   : > { %s908_s19 = sshll.u32 %s1634_s10, 7 }
 0x302   : > { %p911_p9 = scmp.eq.s32.totalorder %s908_s19, 0 }
 0x303   : > { %s1574_s12 = sshrl.u32 (!%p911_p9), %s1634_s10, 1 }
 0x304   : > { %646 = sbr.rel (%p911_p9) target bundleno = 817 (0x331), region = 64  ;;  %p912_p12 = scmp.le.s32.totalorder (!%p911_p9), %s1574_s12, 0 }
 0x30b   : > { %813 = sbr.rel (%p912_p12) target bundleno = 796 (0x31c), region = 146  ;;  %s1256_s28 = smov (!%p912_p12), %s1568_s17  }
 0x30c   : > { %s1260_s18 = smov (!%p912_p12), %s1557_s21   ;;  %s1264_s27 = smov (!%p912_p12), 0  }
 0x30d   : > { %s1268_s20 = smov (!%p912_p12), 0  }
 0x312 LB: >> { %v710_v49 = vld [vmem:[%s1262_s18] sm:$0xff]  ;;  %v712_v50 = vld [vmem:[%s1262_s18 + $0x8] sm:$0xff]  ;;  %s714_s11 = sadd.s32 1, %s1266_s27  ;;  %s704_s20 = sadd.s32 1, %s1270_s20   ;;  %s1270_s20 = sphi %s1268_s20, %s704_s20   ;;  %s1266_s27 = sphi %s1264_s27, %s1265_s27   ;;  %s1262_s18 = sphi %s1260_s18, %s719_s18   ;;  %s1258_s28 = sphi %s1256_s28, %s720_s28  }
 0x313   : >> { %711 = vst [vmem:[%s1258_s28] sm:$0xff] %v710_v49  ;;  %713 = vst [vmem:[%s1258_s28 + $0x8] sm:$0xff] %v712_v50  ;;  %p715_p0 = scmp.ge.s32.totalorder %s714_s11, %s1574_s12  ;;  %p703_p2 = scmp.ge.s32.totalorder %s704_s20, %s1574_s12 }
 0x315   : >> { %s1636_s11 = smov (%p715_p0, %s714_s11), 0  ;;  %706 = sbr.rel (!%p703_p2) target bundleno = 786 (0x312), region = 152 }
 0x316   : >> { %s913_s13 = sshll.u32 %s1636_s11, 4  ;;  %s1265_s27 = smov %s1636_s11  }
 0x317   : >> { %s719_s18 = scalar_lea.vmem %s1557_s21, %s913_s13 [#allocation6]   ;;  %s720_s28 = scalar_lea.vmem %s1568_s17, %s913_s13  }
 0x31c PF: > { %s1584_s22 = sand.u32 1, %s1634_s10   ;;  %s925_s23 = sshll.u32 %s1574_s12, 4 }
 0x31d   : > { %s725_s8 = scalar_lea.vmem %s1557_s21, %s925_s23 [#allocation6]   ;;  %s727_s14 = scalar_lea.vmem %s1568_s17, %s925_s23  }
 0x31e   : > { %p918_p4 = scmp.le.s32.totalorder %s1584_s22, 0 }
 0x31f   : > { %s1272_s16 = smov (!%p918_p4), %s727_s14   ;;  %s1276_s15 = smov (!%p918_p4), %s725_s8  }
 0x320   : > { %827 = sbr.rel (%p918_p4) target bundleno = 817 (0x331), region = 157  ;;  %s1280_s24 = smov (!%p918_p4), 0  }
 0x321   : > { %s1284_s30 = smov (!%p918_p4), 0  }
 0x327 LB: >> { %v737_v51 = vld [vmem:[%s1278_s15] sm:$0xff]  ;;  %s739_s10 = sadd.s32 1, %s1282_s24  ;;  %s731_s30 = sadd.s32 1, %s1286_s30   ;;  %s1286_s30 = sphi %s1284_s30, %s731_s30   ;;  %s1282_s24 = sphi %s1280_s24, %s1281_s24   ;;  %s1278_s15 = sphi %s1276_s15, %s744_s15   ;;  %s1274_s16 = sphi %s1272_s16, %s745_s16  }
 0x328   : >> { %738 = vst [vmem:[%s1274_s16] sm:$0xff] %v737_v51  ;;  %p740_p8 = scmp.ge.s32.totalorder %s739_s10, %s1584_s22  ;;  %p730_p10 = scmp.ge.s32.totalorder %s731_s30, %s1584_s22 }
 0x32a   : >> { %s1638_s10 = smov (%p740_p8, %s739_s10), 0  ;;  %733 = sbr.rel (!%p730_p10) target bundleno = 807 (0x327), region = 163 }
 0x32b   : >> { %s919_s21 = sshll.u32 %s1638_s10, 3  ;;  %s1281_s24 = smov %s1638_s10  }
 0x32c   : >> { %s744_s15 = scalar_lea.vmem %s725_s8, %s919_s21 [#allocation6]   ;;  %s745_s16 = scalar_lea.vmem %s727_s14, %s919_s21  }
 0x331 PF: > { %p18_p13 = scmp.ge.s32.totalorder %s1358_s29, 4   ;;  %s1627_s24 = smov %s1246_s25 }
 0x332   : > { %s1628_s25 = smov %s1250_s26  ;;  %s1629_s26 = smov %s1368_s9 }
 0x333   : > { %s1630_s27 = smov %s1358_s29  ;;  %20 = sbr.rel (!%p18_p13) target bundleno = 4 (0x4), region = 174 }
 0x33a   :  { %761 = vsyncpa [#allocation3], 1 }
 0x33b   :  { %763 = vsyncpa [#allocation3 + $0x1], 1 }
 0x33c   :  { %764 = vsyncpa [#allocation5], 1 }

</bundles_post_ra>
